<compile_context>
chip_gen: v6e
topology: v6e:2x2x1
jax: 0.10.0
libtpu: 0.0.40
codegen_flags: <defaults>
</compile_context>

<pallas_src>
import jax
import jax.numpy as jnp
from jax.experimental import pallas as pl
from jax.experimental.pallas import tpu as pltpu

_SUBLANE = 8
_MAX_BATCH_TILE = 1024
_FALLBACK_VMEM_CAPACITY = 64 * 1024 * 1024   # v7x per-TC (smallest generation)
_MIN_VMEM_LIMIT = 4 * 1024 * 1024            # Mosaic internal scratch headroom


def _round_up(x, m):
    return ((x + m - 1) // m) * m


def _tpu_info():
    try:
        return pltpu.get_tpu_info()
    except Exception:
        return None


def _num_tensorcores():
    """Best-effort TensorCore count (2 on v7x, 1 on v5e/v6e); defaults to 1."""
    info = _tpu_info()
    if info is not None:
        for attr in ("num_cores", "core_count", "num_tensorcores",
                     "tensor_core_count", "cores_per_chip"):
            v = getattr(info, attr, None)
            if isinstance(v, int) and v > 0:
                return v
    try:
        kind = jax.devices()[0].device_kind.lower()
    except Exception:
        return 1
    return 2 if "v7" in kind else 1


def _vmem_budget():
    """~70% of the reported VMEM capacity; conservative fallback if unknown."""
    cap = None
    info = _tpu_info()
    if info is not None:
        for attr in ("vmem_capacity_bytes", "vmem_bytes", "vmem_size_bytes"):
            v = getattr(info, attr, None)
            if isinstance(v, int) and v > 0:
                cap = v
                break
    if cap is None:
        cap = _FALLBACK_VMEM_CAPACITY
    return int(cap * 0.7)


def _mlp_kernel(x_ref, w1_ref, b1_ref, w2_ref, b2_ref, w3_ref, b3_ref, o_ref):
    # Fused 3-layer MLP on one batch tile.
    # bf16 MXU operands, f32 accumulation + bias-add + tanh (VPU/EUP),
    # intermediates narrowed to bf16 right after the activation.
    x = x_ref[...].astype(jnp.bfloat16)                                 # (tb, in)
    a1 = jnp.dot(x, w1_ref[...], preferred_element_type=jnp.float32) + b1_ref[...]
    h1 = jnp.tanh(a1).astype(jnp.bfloat16)                              # (tb, hid)
    a2 = jnp.dot(h1, w2_ref[...], preferred_element_type=jnp.float32) + b2_ref[...]
    h2 = jnp.tanh(a2).astype(jnp.bfloat16)                              # (tb, hid)
    out = jnp.dot(h2, w3_ref[...], preferred_element_type=jnp.float32) + b3_ref[...]
    o_ref[...] = out.astype(o_ref.dtype)                                # (tb, out)


def value_net_forward(x, params, *, batch_tile=None):
    """Fused ValueNet forward pass.

    x: (B, input_dim) float32
    params: dict with w1 (in,h), b1 (1,h), w2 (h,h), b2 (1,h), w3 (h,out), b3 (1,out)
    """
    B, input_dim = x.shape
    hidden = params["w1"].shape[1]
    output_dim = params["w3"].shape[1]

    budget = _vmem_budget()
    cores = _num_tensorcores()

    # Resident (single-buffered) weights/biases; per-row pipelined bytes:
    # x f32 double-buffered + out f32 double-buffered + bf16 x cast +
    # f32 accumulator + bf16 h1/h2 intermediates (rough upper bound).
    weight_bytes = 2 * (input_dim * hidden + hidden * hidden + hidden * output_dim)
    bias_bytes = 4 * (2 * hidden + output_dim)
    resident_bytes = weight_bytes + bias_bytes
    per_row_bytes = 10 * input_dim + 8 * output_dim + 8 * hidden

    if resident_bytes + _SUBLANE * per_row_bytes > budget:
        # TODO(synk): add a hidden-dim (K/N) grid axis with an f32 accumulator
        # so huge hidden sizes tile instead of failing outright.
        raise ValueError(
            f"ValueNet weights ({resident_bytes} B) do not fit the VMEM budget "
            f"({budget} B); hidden-dim tiling is not implemented."
        )

    if batch_tile is None:
        tb = min(_MAX_BATCH_TILE, _round_up(B, _SUBLANE))
        avail = budget - resident_bytes
        tb_vmem = max(_SUBLANE, (avail // per_row_bytes) // _SUBLANE * _SUBLANE)
        tb = min(tb, tb_vmem)
        # Only split the batch for megacore (>=2 TCs) and only when the batch
        # naturally spans >= 2 sublane groups; never pad the batch for it.
        if cores >= 2 and B >= 2 * _SUBLANE:
            tb = min(tb, _round_up(pl.cdiv(B, cores), _SUBLANE))
        tb = max(_SUBLANE, (tb // _SUBLANE) * _SUBLANE)
    else:
        tb = max(_SUBLANE, _round_up(int(batch_tile), _SUBLANE))

    grid = (pl.cdiv(B, tb),)

    # Weights as bf16 (MXU operand dtype); biases stay f32.  These are tiny,
    # resident and single-buffered, so the one-time cast is negligible.
    w1 = params["w1"].astype(jnp.bfloat16)
    w2 = params["w2"].astype(jnp.bfloat16)
    w3 = params["w3"].astype(jnp.bfloat16)
    b1 = params["b1"].astype(jnp.float32)
    b2 = params["b2"].astype(jnp.float32)
    b3 = params["b3"].astype(jnp.float32)

    const = pl.Buffered(1)  # constant index_map -> single-buffered, loaded once
    in_specs = [
        pl.BlockSpec((tb, input_dim), lambda i: (i, 0)),                                # x
        pl.BlockSpec((input_dim, hidden), lambda i: (0, 0), pipeline_mode=const),       # w1
        pl.BlockSpec((1, hidden), lambda i: (0, 0), pipeline_mode=const),               # b1
        pl.BlockSpec((hidden, hidden), lambda i: (0, 0), pipeline_mode=const),          # w2
        pl.BlockSpec((1, hidden), lambda i: (0, 0), pipeline_mode=const),               # b2
        pl.BlockSpec((hidden, output_dim), lambda i: (0, 0), pipeline_mode=const),      # w3
        pl.BlockSpec((1, output_dim), lambda i: (0, 0), pipeline_mode=const),           # b3
    ]
    out_spec = pl.BlockSpec((tb, output_dim), lambda i: (i, 0))

    flops = 2 * B * (input_dim * hidden + hidden * hidden + hidden * output_dim)
    transcendentals = 2 * B * hidden
    bytes_accessed = 4 * B * input_dim + resident_bytes + 4 * B * output_dim

    vmem_limit = int(min(
        budget,
        max(_MIN_VMEM_LIMIT, int(1.25 * (resident_bytes + tb * per_row_bytes))),
    ))

    out = pl.pallas_call(
        _mlp_kernel,
        out_shape=jax.ShapeDtypeStruct((B, output_dim), x.dtype),
        grid_spec=pltpu.PrefetchScalarGridSpec(
            num_scalar_prefetch=0,
            grid=grid,
            in_specs=in_specs,
            out_specs=out_spec,
        ),
        compiler_params=pltpu.CompilerParams(
            dimension_semantics=("parallel",),
            vmem_limit_bytes=vmem_limit,
        ),
        cost_estimate=pl.CostEstimate(
            flops=int(flops),
            transcendentals=int(transcendentals),
            bytes_accessed=int(bytes_accessed),
        ),
    )(x, w1, b1, w2, b2, w3, b3)

    return out


def init_value_net_params(key, input_dim, hidden, output_dim):
    """Deterministic init mimicking PyTorch's default Linear init (U[-1/sqrt(fan_in), +])."""
    ks = jax.random.split(key, 6)

    def linear(kw, kb, fan_in, fan_out):
        bound = 1.0 / jnp.sqrt(jnp.float32(fan_in))
        w = jax.random.uniform(kw, (fan_in, fan_out), jnp.float32, -bound, bound)
        b = jax.random.uniform(kb, (1, fan_out), jnp.float32, -bound, bound)
        return w, b

    w1, b1 = linear(ks[0], ks[1], input_dim, hidden)
    w2, b2 = linear(ks[2], ks[3], hidden, hidden)
    w3, b3 = linear(ks[4], ks[5], hidden, output_dim)
    return {"w1": w1, "b1": b1, "w2": w2, "b2": b2, "w3": w3, "b3": b3}


def _reference_forward(x, p):
    h1 = jnp.tanh(x @ p["w1"] + p["b1"])
    h2 = jnp.tanh(h1 @ p["w2"] + p["b2"])
    return h2 @ p["w3"] + p["b3"]


if __name__ == "__main__":
    key = jax.random.PRNGKey(0)
    k_param, k_x = jax.random.split(key)

    batch, input_dim, hidden, output_dim = 8, 16, 32, 4

    params = init_value_net_params(k_param, input_dim, hidden, output_dim)
    x = jax.random.normal(k_x, (batch, input_dim), jnp.float32)

    out = value_net_forward(x, params)
    out = jax.block_until_ready(out)

    ref = _reference_forward(x, params)
    assert out.shape == (batch, output_dim)
    # bf16 matmul operands / intermediates (f32 accumulation) -> relaxed tolerance.
    assert jnp.allclose(out, ref, atol=2e-2, rtol=2e-2), float(jnp.abs(out - ref).max())

    print("KERNEL_OK")
</pallas_src>

<mosaic_0001>
module attributes {stable_mosaic.version = 11 : i64} {
  func.func @_mlp_kernel(%arg0: i32, %arg1: memref<8x16xf32, #tpu.memory_space<vmem>>, %arg2: memref<16x32xbf16, #tpu.memory_space<vmem>>, %arg3: memref<1x32xf32, #tpu.memory_space<vmem>>, %arg4: memref<32x32xbf16, #tpu.memory_space<vmem>>, %arg5: memref<1x32xf32, #tpu.memory_space<vmem>>, %arg6: memref<32x4xbf16, #tpu.memory_space<vmem>>, %arg7: memref<1x4xf32, #tpu.memory_space<vmem>>, %arg8: memref<8x4xf32, #tpu.memory_space<vmem>>) attributes {dimension_semantics = [#tpu.dimension_semantics<parallel>], iteration_bounds = array<i64: 1>, scalar_prefetch = 0 : i64, scratch_operands = 0 : i64, tpu.core_type = #tpu.core_type<tc>, window_params = [{transform_indices = @transform_0, window_bounds = array<i64: 8, 16>}, {pipeline_mode = #tpu.pipeline_mode<synchronous>, transform_indices = @transform_1, window_bounds = array<i64: 16, 32>}, {pipeline_mode = #tpu.pipeline_mode<synchronous>, transform_indices = @transform_2, window_bounds = array<i64: 1, 32>}, {pipeline_mode = #tpu.pipeline_mode<synchronous>, transform_indices = @transform_3, window_bounds = array<i64: 32, 32>}, {pipeline_mode = #tpu.pipeline_mode<synchronous>, transform_indices = @transform_4, window_bounds = array<i64: 1, 32>}, {pipeline_mode = #tpu.pipeline_mode<synchronous>, transform_indices = @transform_5, window_bounds = array<i64: 32, 4>}, {pipeline_mode = #tpu.pipeline_mode<synchronous>, transform_indices = @transform_6, window_bounds = array<i64: 1, 4>}, {transform_indices = @transform_7, window_bounds = array<i64: 8, 4>}]} {
    %c0 = arith.constant 0 : index
    %c0_0 = arith.constant 0 : index
    %0 = vector.load %arg1[%c0, %c0_0] : memref<8x16xf32, #tpu.memory_space<vmem>>, vector<8x16xf32>
    %1 = arith.truncf %0 : vector<8x16xf32> to vector<8x16xbf16>
    %c0_1 = arith.constant 0 : index
    %c0_2 = arith.constant 0 : index
    %2 = vector.load %arg2[%c0_1, %c0_2] : memref<16x32xbf16, #tpu.memory_space<vmem>>, vector<16x32xbf16>
    %cst = arith.constant dense<0.000000e+00> : vector<8x32xf32>
    %3 = tpu.matmul %1, %2, %cst {dimension_numbers = #tpu.dot_dimension_numbers<[1], [0], [0], [1], [0, 0, 1, 1], [], []>} : vector<8x16xbf16>, vector<16x32xbf16>, vector<8x32xf32> -> vector<8x32xf32>
    %c0_3 = arith.constant 0 : index
    %c0_4 = arith.constant 0 : index
    %4 = vector.load %arg3[%c0_3, %c0_4] : memref<1x32xf32, #tpu.memory_space<vmem>>, vector<1x32xf32>
    %5 = vector.broadcast %4 : vector<1x32xf32> to vector<8x32xf32>
    %6 = arith.addf %3, %5 : vector<8x32xf32>
    %7 = math.tanh %6 : vector<8x32xf32>
    %8 = arith.truncf %7 : vector<8x32xf32> to vector<8x32xbf16>
    %c0_5 = arith.constant 0 : index
    %c0_6 = arith.constant 0 : index
    %9 = vector.load %arg4[%c0_5, %c0_6] : memref<32x32xbf16, #tpu.memory_space<vmem>>, vector<32x32xbf16>
    %cst_7 = arith.constant dense<0.000000e+00> : vector<8x32xf32>
    %10 = tpu.matmul %8, %9, %cst_7 {dimension_numbers = #tpu.dot_dimension_numbers<[1], [0], [0], [1], [0, 0, 1, 1], [], []>} : vector<8x32xbf16>, vector<32x32xbf16>, vector<8x32xf32> -> vector<8x32xf32>
    %c0_8 = arith.constant 0 : index
    %c0_9 = arith.constant 0 : index
    %11 = vector.load %arg5[%c0_8, %c0_9] : memref<1x32xf32, #tpu.memory_space<vmem>>, vector<1x32xf32>
    %12 = vector.broadcast %11 : vector<1x32xf32> to vector<8x32xf32>
    %13 = arith.addf %10, %12 : vector<8x32xf32>
    %14 = math.tanh %13 : vector<8x32xf32>
    %15 = arith.truncf %14 : vector<8x32xf32> to vector<8x32xbf16>
    %c0_10 = arith.constant 0 : index
    %c0_11 = arith.constant 0 : index
    %16 = vector.load %arg6[%c0_10, %c0_11] : memref<32x4xbf16, #tpu.memory_space<vmem>>, vector<32x4xbf16>
    %cst_12 = arith.constant dense<0.000000e+00> : vector<8x4xf32>
    %17 = tpu.matmul %15, %16, %cst_12 {dimension_numbers = #tpu.dot_dimension_numbers<[1], [0], [0], [1], [0, 0, 1, 1], [], []>} : vector<8x32xbf16>, vector<32x4xbf16>, vector<8x4xf32> -> vector<8x4xf32>
    %c0_13 = arith.constant 0 : index
    %c0_14 = arith.constant 0 : index
    %18 = vector.load %arg7[%c0_13, %c0_14] : memref<1x4xf32, #tpu.memory_space<vmem>>, vector<1x4xf32>
    %19 = vector.broadcast %18 : vector<1x4xf32> to vector<8x4xf32>
    %20 = arith.addf %17, %19 : vector<8x4xf32>
    %c0_15 = arith.constant 0 : index
    %c0_16 = arith.constant 0 : index
    %21 = vector.load %arg8[%c0_15, %c0_16] : memref<8x4xf32, #tpu.memory_space<vmem>>, vector<8x4xf32>
    tpu.vector_store %arg8[%c0_15, %c0_16], %20 {strides = array<i32>} : memref<8x4xf32, #tpu.memory_space<vmem>>, vector<8x4xf32>,
    return
  }
  func.func @transform_0(%arg0: i32) -> (i32, i32) {
    %c0_i32 = arith.constant 0 : i32
    %c0_i32_0 = arith.constant 0 : i32
    return %arg0, %c0_i32 : i32, i32
  }
  func.func @transform_1(%arg0: i32) -> (i32, i32) {
    %c0_i32 = arith.constant 0 : i32
    %c0_i32_0 = arith.constant 0 : i32
    %c0_i32_1 = arith.constant 0 : i32
    return %c0_i32, %c0_i32_0 : i32, i32
  }
  func.func @transform_2(%arg0: i32) -> (i32, i32) {
    %c0_i32 = arith.constant 0 : i32
    %c0_i32_0 = arith.constant 0 : i32
    %c0_i32_1 = arith.constant 0 : i32
    return %c0_i32, %c0_i32_0 : i32, i32
  }
  func.func @transform_3(%arg0: i32) -> (i32, i32) {
    %c0_i32 = arith.constant 0 : i32
    %c0_i32_0 = arith.constant 0 : i32
    %c0_i32_1 = arith.constant 0 : i32
    return %c0_i32, %c0_i32_0 : i32, i32
  }
  func.func @transform_4(%arg0: i32) -> (i32, i32) {
    %c0_i32 = arith.constant 0 : i32
    %c0_i32_0 = arith.constant 0 : i32
    %c0_i32_1 = arith.constant 0 : i32
    return %c0_i32, %c0_i32_0 : i32, i32
  }
  func.func @transform_5(%arg0: i32) -> (i32, i32) {
    %c0_i32 = arith.constant 0 : i32
    %c0_i32_0 = arith.constant 0 : i32
    %c0_i32_1 = arith.constant 0 : i32
    return %c0_i32, %c0_i32_0 : i32, i32
  }
  func.func @transform_6(%arg0: i32) -> (i32, i32) {
    %c0_i32 = arith.constant 0 : i32
    %c0_i32_0 = arith.constant 0 : i32
    %c0_i32_1 = arith.constant 0 : i32
    return %c0_i32, %c0_i32_0 : i32, i32
  }
  func.func @transform_7(%arg0: i32) -> (i32, i32) {
    %c0_i32 = arith.constant 0 : i32
    %c0_i32_0 = arith.constant 0 : i32
    return %arg0, %c0_i32 : i32, i32
  }
}

</mosaic_0001>

<bundles_post_ra>
// kernel: tpu_custom_call.1
= control target key start
LH: loop header
LB: loop body
LE: loop exit
PB: predicated region body
PF: predicated region fallthrough
CT: control target
= control target key end

     0   :  { %12 = vsyncpa [#allocation3], 0  ;;  %s437_s0 = inlined_call_operand.hbm [shape: f32[8,16], index: 0, kind: input, shape index: {}]   ;;  %s438_s1 = inlined_call_operand.hbm [shape: bf16[16,32], index: 1, kind: input, shape index: {}]   ;;  %s439_s2 = inlined_call_operand.vmem [shape: f32[1,32], index: 2, kind: input, shape index: {}]   ;;  %s440_s3 = inlined_call_operand.vmem [shape: bf16[32,32], index: 3, kind: input, shape index: {}]   ;;  %s441_s4 = inlined_call_operand.vmem [shape: f32[1,32], index: 4, kind: input, shape index: {}]   ;;  %s442_s5 = inlined_call_operand.vmem [shape: bf16[32,4], index: 5, kind: input, shape index: {}]   ;;  %s443_s6 = inlined_call_operand.vmem [shape: f32[1,4], index: 6, kind: input, shape index: {}]   ;;  %s444_s7 = inlined_call_operand.vmem [shape: f32[8,4], index: 7, kind: output, shape index: {}]  }
   0x1   :  { %13 = vsyncpa [#allocation5], 0  ;;  %s359_s24 = smov [#allocation2]   ;;  %s360_s26 = smov [#allocation4]  }
   0x2   :  { %s20_s25 = sshll.u32 %s359_s24, 4  ;;  %s29_s27 = sshll.u32 %s360_s26, 4  ;;  %s21_s25 = int_to_ptr.vmem [resolvable:$true] %s20_s25  ;;  %s30_s27 = int_to_ptr.vmem [resolvable:$true] %s29_s27 }
   0x3   :  { %s323_s28 = scalar_lea.vmem %s21_s25, 128  ;;  %p328_p1 = scmp.lt.s32.totalorder %s21_s25, %s21_s25 }
   0x4   :  { %p324_p0 = scmp.ne.s32.totalorder %s21_s25, %s323_s28  ;;  %p329_p2 = scmp.lt.s32.totalorder %s323_s28, %s323_s28 }
   0x6   :  { %p330_p3 = por %p329_p2, %p328_p1 }
   0x8   :  { %p331_p4 = pnand %p330_p3, %p324_p0 }
   0xa   :  { %334 = shalt.err (!%p331_p4)
}
   0xb   :  { %23 = dma.hbm_to_vmem [thread:$0]  %s437_s0, 128, %s21_s25, [#allocation3]  }
   0xc   :  { %s343_s8 = scalar_lea.vmem %s30_s27, 128  ;;  %p348_p6 = scmp.lt.s32.totalorder %s30_s27, %s30_s27 }
   0xd   :  { %p344_p5 = scmp.ne.s32.totalorder %s30_s27, %s343_s8  ;;  %p349_p7 = scmp.lt.s32.totalorder %s343_s8, %s343_s8 }
   0xf   :  { %p350_p8 = por %p349_p7, %p348_p6 }
  0x11   :  { %p351_p9 = pnand %p350_p8, %p344_p5 }
  0x13   :  { %354 = shalt.err (!%p351_p9)
}
  0x14   :  { %s361_s9 = smov 64   ;;  %s362_s10 = smov 4  }
  0x15   :  { %35 = dma.hbm_to_vmem [thread:$0]  %s438_s1, 128, %s30_s27, [#allocation5], %s361_s9, %s361_s9, %s362_s10  }
  0x16   :  { %355 = dma.done.wait [#allocation3], 128  }
  0x17   :  { %356 = vsyncadd [#allocation3], 4294967168 }
  0x18   :  { %357 = dma.done.wait [#allocation5], 128  }
  0x19   :  { %358 = vsyncadd [#allocation5], 4294967168  ;;  %v363_v0 = vmov 0.0   ;;  %vm364_vm0 = vmmov 0   ;;  %v306_v1 = vld [vmem:[#allocation4] sm:$0xff]   ;;  %v53_v2 = vld [vmem:[#allocation2] sm:$0xff] }
  0x1a   :  { %278 = vmatprep.subr.bf16.mxu0 %v363_v0  ;;  %280 = vmatprep.mubr.msk.bf16.mxu0 %vm364_vm0, %v363_v0  ;;  %vm70_vm1 = vcmask 130048   ;;  %v54_v3 = vpack.c.bf16 %v53_v2, %v53_v2  ;;  %v307_v4 = vld [vmem:[%s440_s3 + $0x8] sm:$0xff]   ;;  %v308_v5 = vld [vmem:[%s440_s3] sm:$0xff]   ;;  %vm139_vm2 = vcmask 261120   ;;  %vm251_vm3 = vcmask 31744  }
  0x1b   :  { %284 = vmatprep.subr.bf16.mxu1 %v363_v0  ;;  %288 = vmatprep.mubr.msk.bf16.mxu1 %vm364_vm0, %v363_v0  ;;  %v259_v6 = vld [vmem:[%s439_s2] ss:$0 sm:$0xff]  ;;  %v309_v14 = vld [vmem:[%s442_s5 + $0x8] sm:$0xff]  }
  0x1c   :  { %279 = vmatpush3.bf16.msra.mxu0 %v306_v1  ;;  %285 = vmatpush3.bf16.msra.mxu1 %v307_v4  ;;  %v310_v15 = vld [vmem:[%s442_s5] sm:$0xff]  }
  0x1d   :  { %292 = vmatprep.subr.bf16.mxu0 %v363_v0  ;;  %286 = vmatprep.subr.bf16.mxu1 %v363_v0  ;;  %v262_v16 = vld [vmem:[%s441_s4] ss:$0 sm:$0xff] }
  0x1e   :  { %v266_v24 = vld [vmem:[%s443_s6] ss:$0 sm:$0xff] }
  0x1f   :  { %281 = vmatmul.mubr.msk.bf16.vlgmr.msra.gmra.mxu0 %vm70_vm1, %v54_v3 }
  0x20   :  { %296 = vmatprep.mubr.msk.bf16.mxu0 %vm364_vm0, %v363_v0  ;;  %287 = vmatpush3.bf16.msra.mxu1 %v308_v5 }
  0x21   :  { %293 = vmatpush3.bf16.msra.mxu0 %v309_v14 }
  0x22   :  { %294 = vmatprep.subr.bf16.mxu0 %v363_v0 }
  0x25   :  { %295 = vmatpush3.bf16.msra.mxu0 %v310_v15 }
  0xdf   :  { %v108_v7 = vpop.f32.mrf.mxu0 }
  0xe0   :  { %v109_v8 = vadd.f32 %v259_v6, %v108_v7 }
  0xe1   :  { %v282_v9 = vpop.f32.mrf.mxu0 }
  0xe2   :  { %311 = vtanh.f32 %v109_v8 }
  0xe3   :  { %v111_v10 = vpop.f32.mrf.mxu0 }
  0xe5   :  { %v283_v11 = vpop.f32.mrf.mxu0 }
  0xef   :  { %v312_v12 = vpop.eup %311 }
  0xf0   :  { %v115_v13 = vpack.c.bf16 %v312_v12, %v312_v12 }
  0xf2   :  { %289 = vmatmul.mubr.msk.bf16.vlgmr.msra.gmra.mxu1 %vm139_vm2, %v115_v13 }
 0x1b2   :  { %v177_v17 = vpop.f32.mrf.mxu1 }
 0x1b3   :  { %v178_v18 = vadd.f32 %v262_v16, %v177_v17 }
 0x1b4   :  { %v290_v19 = vpop.f32.mrf.mxu1 }
 0x1b5   :  { %313 = vtanh.f32 %v178_v18 }
 0x1b6   :  { %v180_v20 = vpop.f32.mrf.mxu1 }
 0x1b8   :  { %v291_v21 = vpop.f32.mrf.mxu1 }
 0x1c2   :  { %v314_v22 = vpop.eup %313 }
 0x1c3   :  { %v184_v23 = vpack.c.bf16 %v314_v22, %v314_v22 }
 0x1c5   :  { %297 = vmatmul.mubr.msk.bf16.vlgmr.msra.gmra.mxu0 %vm139_vm2, %v184_v23 }
 0x285   :  { %v245_v25 = vpop.f32.mrf.mxu0 }
 0x286   :  { %v246_v26 = vadd.f32 %v266_v24, %v245_v25 }
 0x287   :  { %v298_v27 = vpop.f32.mrf.mxu0 }
 0x288   :  { %252 = vst.msk [vmem:[%s444_s7] sm:$0xff] %vm251_vm3, %v246_v26 }
 0x289   :  { %v248_v28 = vpop.f32.mrf.mxu0 }
 0x28b   :  { %v299_v29 = vpop.f32.mrf.mxu0 }
 0x28c   :  { %257 = vsyncpa [#allocation3], 1 }
 0x28d   :  { %258 = vsyncpa [#allocation5], 1 }

</bundles_post_ra>
